<compile_context>
chip_gen: v7x
topology: tpu7x:2x2x1
jax: 0.10.0
libtpu: 0.0.40
codegen_flags: <defaults>
</compile_context>

<pallas_src>
import functools

import jax
import jax.numpy as jnp
from jax.experimental import pallas as pl
from jax.experimental.pallas import tpu as pltpu

LANES = 128
MAX_BLOCK_ROWS = 2048   # 2048 x 128 x 4B = 1 MiB per f32 block (safe on v5e/v6e/v7x VMEM)
NC = 2                  # leading "parallel" axis -> both TensorCores on v7x


def _cdiv(a, b):
    return -(-a // b)


def _round_up(a, b):
    return _cdiv(a, b) * b


def _neglog_sum_kernel(x_ref, out_ref, *, bpc, block_elems, n_valid,
                       needs_mask, one_minus, pad_val):
    """Accumulates clamped -log terms of one (block_rows, 128) tile into the
    resident (8, 128) output block of the current core."""
    c = pl.program_id(0)
    i = pl.program_id(1)

    @pl.when(i == 0)
    def _():
        out_ref[...] = jnp.zeros_like(out_ref)

    x = x_ref[...].astype(jnp.float32)
    br, ln = x.shape

    def accumulate(vals):
        # BCE with 0-target: -log(1 - x); with 1-target: -log(x).
        term = (-jnp.log1p(-vals)) if one_minus else (-jnp.log(vals))
        # PyTorch clamps log at -100 -> per-element term <= 100.
        term = jnp.minimum(term, 100.0)
        # Pure VPU partial reduce: vreg-to-vreg adds into the (8, 128) block.
        out_ref[...] += term.reshape(br // 8, 8, ln).sum(axis=0)

    if needs_mask:
        blk = c * bpc + i                       # logical (unclamped) block index
        start = blk * block_elems
        is_full = start + block_elems <= n_valid

        @pl.when(is_full)
        def _():
            accumulate(x)

        @pl.when(jnp.logical_not(is_full))
        def _():
            # Boundary / overflow block: mask out elements past the valid range
            # by substituting the neutral value (whose term is exactly 0).
            row = jax.lax.broadcasted_iota(jnp.int32, x.shape, 0)
            lane = jax.lax.broadcasted_iota(jnp.int32, x.shape, 1)
            gidx = start + row * ln + lane
            accumulate(jnp.where(gidx < n_valid, x, pad_val))
    else:
        accumulate(x)


def _neg_log_mean(x, *, one_minus):
    """mean(-log(1 - x)) if one_minus else mean(-log(x)), clamped like PyTorch BCE."""
    n = x.size
    itemsize = jnp.dtype(x.dtype).itemsize
    row_align = {4: 8, 2: 16, 1: 32}.get(itemsize, 8)
    unit = row_align * LANES
    pad_val = 0.0 if one_minus else 1.0        # neutral value: term == 0

    n_pad = _round_up(n, unit)
    flat = x.reshape(-1)
    if n_pad != n:
        # Only copies when numel is not a multiple of row_align*128.
        flat = jnp.pad(flat, (0, n_pad - n), constant_values=pad_val)
    rows = n_pad // LANES
    x2d = flat.reshape(rows, LANES)            # free reshape in the aligned case

    block_rows = min(MAX_BLOCK_ROWS, rows)     # multiple of row_align, <= rows
    block_elems = block_rows * LANES
    nblocks = _cdiv(rows, block_rows)
    bpc = _cdiv(nblocks, NC)                   # blocks per core
    needs_mask = (NC * bpc * block_elems != n_pad)
    last_block = nblocks - 1

    kernel = functools.partial(
        _neglog_sum_kernel,
        bpc=bpc, block_elems=block_elems, n_valid=n_pad,
        needs_mask=needs_mask, one_minus=one_minus, pad_val=pad_val)

    partials = pl.pallas_call(
        kernel,
        out_shape=jax.ShapeDtypeStruct((NC * 8, LANES), jnp.float32),
        grid_spec=pltpu.PrefetchScalarGridSpec(
            num_scalar_prefetch=0,
            grid=(NC, bpc),
            in_specs=[pl.BlockSpec(
                (block_rows, LANES),
                # Clamp so overflow iterations re-read a valid block (masked to 0).
                lambda c, i: (jnp.minimum(c * bpc + i, last_block), 0))],
            out_specs=pl.BlockSpec((8, LANES), lambda c, i: (c, 0)),
        ),
        compiler_params=pltpu.CompilerParams(
            dimension_semantics=("parallel", "arbitrary")),
        cost_estimate=pl.CostEstimate(
            flops=3 * n_pad,
            transcendentals=n_pad,
            bytes_accessed=itemsize * n_pad + NC * 8 * LANES * 4),
    )(x2d)

    return jnp.sum(partials) / jnp.float32(n)


@jax.jit
def sgan_d_loss(fake_judge, real_judge):
    """Pallas implementation of Loss.forward from program/loss/SGAN_D.py:
       BCE(fake, zeros) + BCE(real, ones) = mean(-log(1-fake)) + mean(-log(real))."""
    loss_fake = _neg_log_mean(fake_judge, one_minus=True)
    loss_real = _neg_log_mean(real_judge, one_minus=False)
    return loss_fake + loss_real


if __name__ == "__main__":
    key = jax.random.PRNGKey(0)
    k_fake, k_real = jax.random.split(key)

    # Discriminator outputs are probabilities in (0, 1); NCHW shape.
    N, C, H, W = 2, 4, 16, 16
    eps = 1e-3
    fake_judge = jax.random.uniform(k_fake, (N, C, H, W), jnp.float32,
                                    minval=eps, maxval=1.0 - eps)
    real_judge = jax.random.uniform(k_real, (N, C, H, W), jnp.float32,
                                    minval=eps, maxval=1.0 - eps)

    loss = jax.block_until_ready(sgan_d_loss(fake_judge, real_judge))

    # Pure-JAX reference: -log(1 - fake).mean() - log(real).mean()
    ref = (-jnp.log1p(-fake_judge)).mean() + (-jnp.log(real_judge)).mean()
    assert jnp.allclose(loss, ref, rtol=1e-5, atol=1e-5), (loss, ref)

    print("KERNEL_OK")
</pallas_src>

<mosaic_0001>
module attributes {stable_mosaic.version = 11 : i64} {
  func.func @_neglog_sum_kernel(%arg0: i32, %arg1: i32, %arg2: memref<16x128xf32, #tpu.memory_space<vmem>>, %arg3: memref<8x128xf32, #tpu.memory_space<vmem>>) attributes {dimension_semantics = [#tpu.dimension_semantics<parallel>, #tpu.dimension_semantics<arbitrary>], iteration_bounds = array<i64: 2, 1>, scalar_prefetch = 0 : i64, scratch_operands = 0 : i64, tpu.core_type = #tpu.core_type<tc>, window_params = [{transform_indices = @transform_0, window_bounds = array<i64: 16, 128>}, {transform_indices = @transform_1, window_bounds = array<i64: 8, 128>}]} {
    %c0_i32 = arith.constant 0 : i32
    %0 = arith.cmpi eq, %arg1, %c0_i32 : i32
    %1 = arith.extui %0 : i1 to i32
    %c0_i32_0 = arith.constant 0 : i32
    %2 = arith.cmpi ne, %1, %c0_i32_0 : i32
    scf.if %2 {
      %cst = arith.constant 0.000000e+00 : f32
      %14 = vector.broadcast %cst : f32 to vector<8x128xf32>
      %c0_6 = arith.constant 0 : index
      %c0_7 = arith.constant 0 : index
      %15 = vector.load %arg3[%c0_6, %c0_7] : memref<8x128xf32, #tpu.memory_space<vmem>>, vector<8x128xf32>
      tpu.vector_store %arg3[%c0_6, %c0_7], %14 {strides = array<i32>} : memref<8x128xf32, #tpu.memory_space<vmem>>, vector<8x128xf32>,
    } else {
    }
    %c0 = arith.constant 0 : index
    %c0_1 = arith.constant 0 : index
    %3 = vector.load %arg2[%c0, %c0_1] : memref<16x128xf32, #tpu.memory_space<vmem>>, vector<16x128xf32>
    %c1_i32 = arith.constant 1 : i32
    %4 = arith.muli %arg0, %c1_i32 : i32
    %5 = arith.addi %4, %arg1 : i32
    %c2048_i32 = arith.constant 2048 : i32
    %6 = arith.muli %5, %c2048_i32 : i32
    %c2048_i32_2 = arith.constant 2048 : i32
    %7 = arith.addi %6, %c2048_i32_2 : i32
    %c2048_i32_3 = arith.constant 2048 : i32
    %8 = arith.cmpi sle, %7, %c2048_i32_3 : i32
    %9 = arith.extui %8 : i1 to i32
    %c0_i32_4 = arith.constant 0 : i32
    %10 = arith.cmpi ne, %9, %c0_i32_4 : i32
    scf.if %10 {
      %cst = arith.constant 0.000000e+00 : f32
      %14 = vector.broadcast %cst : f32 to vector<16x128xf32>
      %15 = arith.subf %14, %3 : vector<16x128xf32>
      %16 = math.log1p %15 : vector<16x128xf32>
      %cst_6 = arith.constant 0.000000e+00 : f32
      %17 = vector.broadcast %cst_6 : f32 to vector<16x128xf32>
      %18 = arith.subf %17, %16 : vector<16x128xf32>
      %cst_7 = arith.constant 1.000000e+02 : f32
      %19 = vector.broadcast %cst_7 : f32 to vector<16x128xf32>
      %20 = arith.minimumf %18, %19 : vector<16x128xf32>
      %c0_8 = arith.constant 0 : index
      %c0_9 = arith.constant 0 : index
      %21 = vector.load %arg3[%c0_8, %c0_9] : memref<8x128xf32, #tpu.memory_space<vmem>>, vector<8x128xf32>
      %22 = vector.shape_cast %20 : vector<16x128xf32> to vector<2x8x128xf32>
      %cst_10 = arith.constant dense<0.000000e+00> : vector<8x128xf32>
      %23 = vector.multi_reduction <add>, %22, %cst_10 [0] : vector<2x8x128xf32> to vector<8x128xf32>
      %24 = arith.addf %21, %23 : vector<8x128xf32>
      %c0_11 = arith.constant 0 : index
      %c0_12 = arith.constant 0 : index
      %25 = vector.load %arg3[%c0_11, %c0_12] : memref<8x128xf32, #tpu.memory_space<vmem>>, vector<8x128xf32>
      tpu.vector_store %arg3[%c0_11, %c0_12], %24 {strides = array<i32>} : memref<8x128xf32, #tpu.memory_space<vmem>>, vector<8x128xf32>,
    } else {
    }
    %true = arith.constant true
    %11 = arith.xori %8, %true : i1
    %12 = arith.extui %11 : i1 to i32
    %c0_i32_5 = arith.constant 0 : i32
    %13 = arith.cmpi ne, %12, %c0_i32_5 : i32
    scf.if %13 {
      %14 = tpu.iota {dimensions = array<i32: 0>} : vector<16x128xi32>
      %15 = tpu.iota {dimensions = array<i32: 1>} : vector<16x128xi32>
      %c128_i32 = arith.constant 128 : i32
      %16 = vector.broadcast %c128_i32 : i32 to vector<16x128xi32>
      %17 = arith.muli %14, %16 : vector<16x128xi32>
      %18 = vector.broadcast %6 : i32 to vector<16x128xi32>
      %19 = arith.addi %18, %17 : vector<16x128xi32>
      %20 = arith.addi %19, %15 : vector<16x128xi32>
      %c2048_i32_6 = arith.constant 2048 : i32
      %21 = vector.broadcast %c2048_i32_6 : i32 to vector<16x128xi32>
      %22 = arith.cmpi slt, %20, %21 : vector<16x128xi32>
      %cst = arith.constant 0.000000e+00 : f32
      %23 = vector.broadcast %cst : f32 to vector<16x128xf32>
      %24 = arith.select %22, %3, %23 : vector<16x128xi1>, vector<16x128xf32>
      %cst_7 = arith.constant 0.000000e+00 : f32
      %25 = vector.broadcast %cst_7 : f32 to vector<16x128xf32>
      %26 = arith.subf %25, %24 : vector<16x128xf32>
      %27 = math.log1p %26 : vector<16x128xf32>
      %cst_8 = arith.constant 0.000000e+00 : f32
      %28 = vector.broadcast %cst_8 : f32 to vector<16x128xf32>
      %29 = arith.subf %28, %27 : vector<16x128xf32>
      %cst_9 = arith.constant 1.000000e+02 : f32
      %30 = vector.broadcast %cst_9 : f32 to vector<16x128xf32>
      %31 = arith.minimumf %29, %30 : vector<16x128xf32>
      %c0_10 = arith.constant 0 : index
      %c0_11 = arith.constant 0 : index
      %32 = vector.load %arg3[%c0_10, %c0_11] : memref<8x128xf32, #tpu.memory_space<vmem>>, vector<8x128xf32>
      %33 = vector.shape_cast %31 : vector<16x128xf32> to vector<2x8x128xf32>
      %cst_12 = arith.constant dense<0.000000e+00> : vector<8x128xf32>
      %34 = vector.multi_reduction <add>, %33, %cst_12 [0] : vector<2x8x128xf32> to vector<8x128xf32>
      %35 = arith.addf %32, %34 : vector<8x128xf32>
      %c0_13 = arith.constant 0 : index
      %c0_14 = arith.constant 0 : index
      %36 = vector.load %arg3[%c0_13, %c0_14] : memref<8x128xf32, #tpu.memory_space<vmem>>, vector<8x128xf32>
      tpu.vector_store %arg3[%c0_13, %c0_14], %35 {strides = array<i32>} : memref<8x128xf32, #tpu.memory_space<vmem>>, vector<8x128xf32>,
    } else {
    }
    return
  }
  func.func @transform_0(%arg0: i32, %arg1: i32) -> (i32, i32) {
    %c1_i32 = arith.constant 1 : i32
    %0 = arith.muli %arg0, %c1_i32 : i32
    %1 = arith.addi %0, %arg1 : i32
    %c0_i32 = arith.constant 0 : i32
    %2 = arith.minsi %1, %c0_i32 : i32
    %c0_i32_0 = arith.constant 0 : i32
    %c0_i32_1 = arith.constant 0 : i32
    return %2, %c0_i32_0 : i32, i32
  }
  func.func @transform_1(%arg0: i32, %arg1: i32) -> (i32, i32) {
    %c0_i32 = arith.constant 0 : i32
    %c0_i32_0 = arith.constant 0 : i32
    return %arg0, %c0_i32 : i32, i32
  }
}

module attributes {stable_mosaic.version = 11 : i64} {
  func.func @_neglog_sum_kernel(%arg0: i32, %arg1: i32, %arg2: memref<16x128xf32, #tpu.memory_space<vmem>>, %arg3: memref<8x128xf32, #tpu.memory_space<vmem>>) attributes {dimension_semantics = [#tpu.dimension_semantics<parallel>, #tpu.dimension_semantics<arbitrary>], iteration_bounds = array<i64: 2, 1>, scalar_prefetch = 0 : i64, scratch_operands = 0 : i64, tpu.core_type = #tpu.core_type<tc>, window_params = [{transform_indices = @transform_0, window_bounds = array<i64: 16, 128>}, {transform_indices = @transform_1, window_bounds = array<i64: 8, 128>}]} {
    %c0_i32 = arith.constant 0 : i32
    %0 = arith.cmpi eq, %arg1, %c0_i32 : i32
    %1 = arith.extui %0 : i1 to i32
    %c0_i32_0 = arith.constant 0 : i32
    %2 = arith.cmpi ne, %1, %c0_i32_0 : i32
    scf.if %2 {
      %cst = arith.constant 0.000000e+00 : f32
      %14 = vector.broadcast %cst : f32 to vector<8x128xf32>
      %c0_6 = arith.constant 0 : index
      %c0_7 = arith.constant 0 : index
      %15 = vector.load %arg3[%c0_6, %c0_7] : memref<8x128xf32, #tpu.memory_space<vmem>>, vector<8x128xf32>
      tpu.vector_store %arg3[%c0_6, %c0_7], %14 {strides = array<i32>} : memref<8x128xf32, #tpu.memory_space<vmem>>, vector<8x128xf32>,
    } else {
    }
    %c0 = arith.constant 0 : index
    %c0_1 = arith.constant 0 : index
    %3 = vector.load %arg2[%c0, %c0_1] : memref<16x128xf32, #tpu.memory_space<vmem>>, vector<16x128xf32>
    %c1_i32 = arith.constant 1 : i32
    %4 = arith.muli %arg0, %c1_i32 : i32
    %5 = arith.addi %4, %arg1 : i32
    %c2048_i32 = arith.constant 2048 : i32
    %6 = arith.muli %5, %c2048_i32 : i32
    %c2048_i32_2 = arith.constant 2048 : i32
    %7 = arith.addi %6, %c2048_i32_2 : i32
    %c2048_i32_3 = arith.constant 2048 : i32
    %8 = arith.cmpi sle, %7, %c2048_i32_3 : i32
    %9 = arith.extui %8 : i1 to i32
    %c0_i32_4 = arith.constant 0 : i32
    %10 = arith.cmpi ne, %9, %c0_i32_4 : i32
    scf.if %10 {
      %14 = math.log %3 : vector<16x128xf32>
      %cst = arith.constant 0.000000e+00 : f32
      %15 = vector.broadcast %cst : f32 to vector<16x128xf32>
      %16 = arith.subf %15, %14 : vector<16x128xf32>
      %cst_6 = arith.constant 1.000000e+02 : f32
      %17 = vector.broadcast %cst_6 : f32 to vector<16x128xf32>
      %18 = arith.minimumf %16, %17 : vector<16x128xf32>
      %c0_7 = arith.constant 0 : index
      %c0_8 = arith.constant 0 : index
      %19 = vector.load %arg3[%c0_7, %c0_8] : memref<8x128xf32, #tpu.memory_space<vmem>>, vector<8x128xf32>
      %20 = vector.shape_cast %18 : vector<16x128xf32> to vector<2x8x128xf32>
      %cst_9 = arith.constant dense<0.000000e+00> : vector<8x128xf32>
      %21 = vector.multi_reduction <add>, %20, %cst_9 [0] : vector<2x8x128xf32> to vector<8x128xf32>
      %22 = arith.addf %19, %21 : vector<8x128xf32>
      %c0_10 = arith.constant 0 : index
      %c0_11 = arith.constant 0 : index
      %23 = vector.load %arg3[%c0_10, %c0_11] : memref<8x128xf32, #tpu.memory_space<vmem>>, vector<8x128xf32>
      tpu.vector_store %arg3[%c0_10, %c0_11], %22 {strides = array<i32>} : memref<8x128xf32, #tpu.memory_space<vmem>>, vector<8x128xf32>,
    } else {
    }
    %true = arith.constant true
    %11 = arith.xori %8, %true : i1
    %12 = arith.extui %11 : i1 to i32
    %c0_i32_5 = arith.constant 0 : i32
    %13 = arith.cmpi ne, %12, %c0_i32_5 : i32
    scf.if %13 {
      %14 = tpu.iota {dimensions = array<i32: 0>} : vector<16x128xi32>
      %15 = tpu.iota {dimensions = array<i32: 1>} : vector<16x128xi32>
      %c128_i32 = arith.constant 128 : i32
      %16 = vector.broadcast %c128_i32 : i32 to vector<16x128xi32>
      %17 = arith.muli %14, %16 : vector<16x128xi32>
      %18 = vector.broadcast %6 : i32 to vector<16x128xi32>
      %19 = arith.addi %18, %17 : vector<16x128xi32>
      %20 = arith.addi %19, %15 : vector<16x128xi32>
      %c2048_i32_6 = arith.constant 2048 : i32
      %21 = vector.broadcast %c2048_i32_6 : i32 to vector<16x128xi32>
      %22 = arith.cmpi slt, %20, %21 : vector<16x128xi32>
      %cst = arith.constant 1.000000e+00 : f32
      %23 = vector.broadcast %cst : f32 to vector<16x128xf32>
      %24 = arith.select %22, %3, %23 : vector<16x128xi1>, vector<16x128xf32>
      %25 = math.log %24 : vector<16x128xf32>
      %cst_7 = arith.constant 0.000000e+00 : f32
      %26 = vector.broadcast %cst_7 : f32 to vector<16x128xf32>
      %27 = arith.subf %26, %25 : vector<16x128xf32>
      %cst_8 = arith.constant 1.000000e+02 : f32
      %28 = vector.broadcast %cst_8 : f32 to vector<16x128xf32>
      %29 = arith.minimumf %27, %28 : vector<16x128xf32>
      %c0_9 = arith.constant 0 : index
      %c0_10 = arith.constant 0 : index
      %30 = vector.load %arg3[%c0_9, %c0_10] : memref<8x128xf32, #tpu.memory_space<vmem>>, vector<8x128xf32>
      %31 = vector.shape_cast %29 : vector<16x128xf32> to vector<2x8x128xf32>
      %cst_11 = arith.constant dense<0.000000e+00> : vector<8x128xf32>
      %32 = vector.multi_reduction <add>, %31, %cst_11 [0] : vector<2x8x128xf32> to vector<8x128xf32>
      %33 = arith.addf %30, %32 : vector<8x128xf32>
      %c0_12 = arith.constant 0 : index
      %c0_13 = arith.constant 0 : index
      %34 = vector.load %arg3[%c0_12, %c0_13] : memref<8x128xf32, #tpu.memory_space<vmem>>, vector<8x128xf32>
      tpu.vector_store %arg3[%c0_12, %c0_13], %33 {strides = array<i32>} : memref<8x128xf32, #tpu.memory_space<vmem>>, vector<8x128xf32>,
    } else {
    }
    return
  }
  func.func @transform_0(%arg0: i32, %arg1: i32) -> (i32, i32) {
    %c1_i32 = arith.constant 1 : i32
    %0 = arith.muli %arg0, %c1_i32 : i32
    %1 = arith.addi %0, %arg1 : i32
    %c0_i32 = arith.constant 0 : i32
    %2 = arith.minsi %1, %c0_i32 : i32
    %c0_i32_0 = arith.constant 0 : i32
    %c0_i32_1 = arith.constant 0 : i32
    return %2, %c0_i32_0 : i32, i32
  }
  func.func @transform_1(%arg0: i32, %arg1: i32) -> (i32, i32) {
    %c0_i32 = arith.constant 0 : i32
    %c0_i32_0 = arith.constant 0 : i32
    return %arg0, %c0_i32 : i32, i32
  }
}

</mosaic_0001>

<bundles_post_ra>
// kernel: sgan_d_loss.2
= control target key start
LH: loop header
LB: loop body
LE: loop exit
PB: predicated region body
PF: predicated region fallthrough
CT: control target
= control target key end

     0   :  { %s382_s6 = smov 0   ;;  %s384_s7 = smov 0   ;;  %s437_s0 = inlined_call_operand.vmem [shape: f32[16,128], index: 0, kind: input, shape index: {}]   ;;  %s438_s1 = inlined_call_operand.vmem [shape: f32[16,128], index: 1, kind: output, shape index: {}]  }
   0x1   :  { %s386_s8 = smov 0  }
   0x2 LB: > { %s23_s9 = sadd.s32 1, %s365_s7  ;;  %p305_p0 = scmp.ge.s32.totalorder %s369_s8, 1  ;;  %s369_s8 = sphi %s386_s8, %s11_s8   ;;  %s365_s7 = sphi %s384_s7, %s440_s7   ;;  %s361_s6 = sphi %s382_s6, %s439_s6  }
   0x3   : > { %p25_p1 = scmp.ge.s32.totalorder %s23_s9, 2  ;;  %p112_p2 = scmp.lt.s32.totalorder %s369_s8, 3 }
   0x5   : > { %s442_s9 = smov (%p25_p1, %s23_s9), 0  ;;  %p113_p3 = pnand %p305_p0, %p112_p2 }
   0x6   : > { %p135_p4 = scmp.lt.s32.totalorder (!%p113_p3), %s361_s6, 0  ;;  %p146_p5 = scmp.lt.s32.totalorder (!%p113_p3), %s361_s6, 1  ;;  %v371_v0 = vmov (!%p113_p3), 0.0  }
   0x7   : > { %116 = sbr.rel (%p113_p3) target bundleno = 93 (0x5d), region = 24  ;;  %s309_s10 = sshll.u32 (!%p113_p3), %s361_s6, 11 }
   0x8   : > { %s409_s14 = sadd.s32 (!%p113_p3), 2048, %s309_s10 }
   0x9   : > { %p310_p7 = scmp.gt.s32.totalorder (!%p113_p3), %s409_s14, 2048 }
   0xe   : > { %s136_s11 = scalar_select %p135_p4, %s361_s6, 0 }
   0xf   : > { %s147_s12 = scalar_select %p146_p5, %s361_s6, 1 }
  0x10   : > { %s306_s13 = sshll.u32 %s136_s11, 1  ;;  %163 = sbr.rel (%p310_p7) target bundleno = 51 (0x33), region = 32 }
  0x11   : > { %p138_p6 = scmp.lt.s32.totalorder %s306_s13, 1  ;;  %s308_s15 = sshll.u32 %s147_s12, 3 }
  0x12   : > { %s414_s18 = scalar_lea.vmem %s438_s1, %s308_s15 }
  0x13   : > { %s444_s13 = smov (!%p138_p6, %s306_s13), 1  ;;  %154 = vst [vmem:[%s414_s18] sm:$0xff] %v371_v0 }
  0x14   : > { %s307_s19 = sshll.u32 %s444_s13, 3 }
  0x15   : > { %s141_s22 = scalar_lea.vmem %s437_s0, %s307_s19 }
  0x16   : > { %v155_v1 = vld [vmem:[%s141_s22] sm:$0xff]  ;;  %v156_v2 = vld [vmem:[%s141_s22 + $0x8] sm:$0xff] }
  0x17   : > { %v164_v3 = vsub.f32 0.0, %v155_v1  ;;  %v165_v4 = vsub.f32 0.0, %v156_v2 }
  0x19   : > { %v166_v5 = vadd.f32 1.0, %v164_v3  ;;  %v175_v6 = vadd.f32 1.0, %v165_v4  ;;  %v169_v7 = vmul.f32 -0.5, %v164_v3  ;;  %v178_v8 = vmul.f32 -0.5, %v165_v4 }
  0x1a   : > { %v172_v10 = vand.u32 2147483647, %v164_v3  ;;  %v181_v12 = vand.u32 2147483647, %v165_v4  ;;  %v188_v25 = vld [vmem:[%s414_s18] sm:$0xff] }
  0x1b   : > { %339 = vlog2.f32 %v166_v5  ;;  %v170_v9 = vadd.f32 1.0, %v169_v7  ;;  %v179_v11 = vadd.f32 1.0, %v178_v8 }
  0x1c   : > { %341 = vlog2.f32 %v175_v6  ;;  %vm173_vm0 = vcmp.lt.f32.partialorder %v172_v10, 0.0004427343  ;;  %vm182_vm1 = vcmp.lt.f32.partialorder %v181_v12, 0.0004427343 }
  0x1d   : > { %v171_v13 = vmul.f32 %v170_v9, %v164_v3  ;;  %v180_v15 = vmul.f32 %v179_v11, %v165_v4 }
  0x25   : > { %v340_v14 = vpop.eup %339 }
  0x26   : > { %v342_v16 = vpop.eup %341  ;;  %v168_v17 = vmul.f32 0.6931472, %v340_v14 }
  0x27   : > { %v177_v18 = vmul.f32 0.6931472, %v342_v16 }
  0x28   : > { %v174_v19 = vsel %vm173_vm0, %v171_v13, %v168_v17 }
  0x29   : > { %v183_v20 = vsel %vm182_vm1, %v180_v15, %v177_v18  ;;  %v184_v21 = vsub.f32 0.0, %v174_v19 }
  0x2a   : > { %v185_v22 = vsub.f32 0.0, %v183_v20 }
  0x2b   : > { %v186_v23 = vmin.f32 %v184_v21, 100.0 }
  0x2c   : > { %v187_v24 = vmin.f32 %v185_v22, 100.0 }
  0x2e   : > { %v189_v26 = vadd.f32 %v187_v24, %v186_v23 }
  0x30   : > { %v190_v27 = vadd.f32 %v189_v26, %v188_v25 }
  0x32   : > { %191 = vst [vmem:[%s414_s18] sm:$0xff] %v190_v27 }
  0x33 PF: > { %p311_p8 = scmp.le.s32.totalorder %s409_s14, 2048 }
  0x34   : > { %v196_v28 = vlaneseq (!%p311_p8)  ;;  %v203_v30 = vstv (!%p311_p8), %s309_s10 }
  0x35   : > { %195 = sbr.rel (%p311_p8) target bundleno = 93 (0x5d), region = 36 }
  0x36   : > { %v197_v29 = vshrl.u32 (!%p311_p8), %v196_v28, 7  ;;  %v200_v32 = vand.u32 (!%p311_p8), 127, %v196_v28 }
  0x38   : > { %v198_v31 = vadd.s32 (!%p311_p8), 8, %v197_v29  ;;  %v201_v33 = vmul.u32 (!%p311_p8), 128, %v197_v29 }
  0x39   : > { %v236_v63 = vld [vmem:[%s414_s18] sm:$0xff] (!%p311_p8) }
  0x3a   : > { %v202_v34 = vmul.u32 (!%p311_p8), 128, %v198_v31  ;;  %v204_v35 = vadd.s32 (!%p311_p8), %v203_v30, %v201_v33 }
  0x3c   : > { %v205_v36 = vadd.s32 %v203_v30, %v202_v34  ;;  %v206_v37 = vadd.s32 %v204_v35, %v200_v32 }
  0x3e   : > { %v207_v38 = vadd.s32 %v205_v36, %v200_v32  ;;  %vm208_vm2 = vcmp.lt.s32.totalorder %v206_v37, 2048 }
  0x3f   : > { %v210_v39 = vsel %vm208_vm2, %v155_v1, 0.0 }
  0x40   : > { %vm209_vm3 = vcmp.lt.s32.totalorder %v207_v38, 2048  ;;  %v212_v40 = vsub.f32 0.0, %v210_v39 }
  0x41   : > { %v211_v41 = vsel %vm209_vm3, %v156_v2, 0.0 }
  0x42   : > { %v213_v42 = vsub.f32 0.0, %v211_v41  ;;  %v214_v43 = vadd.f32 1.0, %v212_v40  ;;  %v217_v45 = vmul.f32 -0.5, %v212_v40  ;;  %v220_v48 = vand.u32 2147483647, %v212_v40 }
  0x44   : > { %343 = vlog2.f32 %v214_v43  ;;  %v223_v44 = vadd.f32 1.0, %v213_v42  ;;  %v226_v46 = vmul.f32 -0.5, %v213_v42  ;;  %v218_v47 = vadd.f32 1.0, %v217_v45 }
  0x45   : > { %v229_v50 = vand.u32 2147483647, %v213_v42  ;;  %vm221_vm4 = vcmp.lt.f32.partialorder %v220_v48, 0.0004427343 }
  0x46   : > { %345 = vlog2.f32 %v223_v44  ;;  %v227_v49 = vadd.f32 1.0, %v226_v46  ;;  %v219_v51 = vmul.f32 %v218_v47, %v212_v40 }
  0x47   : > { %vm230_vm5 = vcmp.lt.f32.partialorder %v229_v50, 0.0004427343 }
  0x48   : > { %v228_v54 = vmul.f32 %v227_v49, %v213_v42 }
  0x4e   : > { %v344_v52 = vpop.eup %343 }
  0x4f   : > { %v216_v53 = vmul.f32 0.6931472, %v344_v52 }
  0x50   : > { %v346_v55 = vpop.eup %345 }
  0x51   : > { %v222_v56 = vsel %vm221_vm4, %v219_v51, %v216_v53  ;;  %v225_v57 = vmul.f32 0.6931472, %v346_v55 }
  0x52   : > { %v232_v58 = vsub.f32 0.0, %v222_v56 }
  0x53   : > { %v231_v59 = vsel %vm230_vm5, %v228_v54, %v225_v57 }
  0x54   : > { %v233_v60 = vsub.f32 0.0, %v231_v59  ;;  %v234_v61 = vmin.f32 %v232_v58, 100.0 }
  0x56   : > { %v235_v62 = vmin.f32 %v233_v60, 100.0 }
  0x58   : > { %v237_v0 = vadd.f32 %v235_v62, %v234_v61 }
  0x5a   : > { %v238_v1 = vadd.f32 %v237_v0, %v236_v63 }
  0x5c   : > { %239 = vst [vmem:[%s414_s18] sm:$0xff] %v238_v1 }
  0x5d PF: > { %s11_s8 = sadd.s32 1, %s369_s8   ;;  %s439_s6 = smov %s365_s7 }
  0x5e   : > { %p8_p9 = scmp.ge.s32.totalorder %s11_s8, 4   ;;  %s440_s7 = smov %s442_s9 }
  0x60   :  { %10 = sbr.rel (!%p8_p9) target bundleno = 2 (0x2), region = 66 }

// kernel: sgan_d_loss.3
= control target key start
LH: loop header
LB: loop body
LE: loop exit
PB: predicated region body
PF: predicated region fallthrough
CT: control target
= control target key end

     0   :  { %s350_s6 = smov 0   ;;  %s352_s7 = smov 0   ;;  %s401_s0 = inlined_call_operand.vmem [shape: f32[16,128], index: 0, kind: input, shape index: {}]   ;;  %s402_s1 = inlined_call_operand.vmem [shape: f32[16,128], index: 1, kind: output, shape index: {}]  }
   0x1   :  { %s354_s8 = smov 0  }
   0x2 LB: > { %s23_s9 = sadd.s32 1, %s333_s7  ;;  %p273_p0 = scmp.ge.s32.totalorder %s337_s8, 1  ;;  %s337_s8 = sphi %s354_s8, %s11_s8   ;;  %s333_s7 = sphi %s352_s7, %s404_s7   ;;  %s329_s6 = sphi %s350_s6, %s403_s6  }
   0x3   : > { %p25_p1 = scmp.ge.s32.totalorder %s23_s9, 2  ;;  %p112_p2 = scmp.lt.s32.totalorder %s337_s8, 3 }
   0x5   : > { %s406_s9 = smov (%p25_p1, %s23_s9), 0  ;;  %p113_p3 = pnand %p273_p0, %p112_p2 }
   0x6   : > { %p135_p4 = scmp.lt.s32.totalorder (!%p113_p3), %s329_s6, 0  ;;  %p146_p5 = scmp.lt.s32.totalorder (!%p113_p3), %s329_s6, 1  ;;  %v339_v0 = vmov (!%p113_p3), 0.0  }
   0x7   : > { %116 = sbr.rel (%p113_p3) target bundleno = 83 (0x53), region = 24  ;;  %s277_s10 = sshll.u32 (!%p113_p3), %s329_s6, 11 }
   0x8   : > { %s159_s14 = sadd.s32 (!%p113_p3), 2048, %s277_s10 }
   0x9   : > { %p278_p7 = scmp.gt.s32.totalorder (!%p113_p3), %s159_s14, 2048 }
   0xe   : > { %s136_s11 = scalar_select %p135_p4, %s329_s6, 0 }
   0xf   : > { %s147_s12 = scalar_select %p146_p5, %s329_s6, 1 }
  0x10   : > { %s274_s13 = sshll.u32 %s136_s11, 1  ;;  %163 = sbr.rel (%p278_p7) target bundleno = 46 (0x2e), region = 32 }
  0x11   : > { %p138_p6 = scmp.lt.s32.totalorder %s274_s13, 1  ;;  %s276_s15 = sshll.u32 %s147_s12, 3 }
  0x12   : > { %s380_s18 = scalar_lea.vmem %s402_s1, %s276_s15 }
  0x13   : > { %s408_s13 = smov (!%p138_p6, %s274_s13), 1  ;;  %154 = vst [vmem:[%s380_s18] sm:$0xff] %v339_v0 }
  0x14   : > { %s275_s19 = sshll.u32 %s408_s13, 3 }
  0x15   : > { %s141_s22 = scalar_lea.vmem %s401_s0, %s275_s19 }
  0x16   : > { %v155_v1 = vld [vmem:[%s141_s22] sm:$0xff]  ;;  %v156_v2 = vld [vmem:[%s141_s22 + $0x8] sm:$0xff] }
  0x17   : > { %307 = vlog2.f32 %v155_v1 }
  0x18   : > { %309 = vlog2.f32 %v156_v2 }
  0x1a   : > { %v172_v11 = vld [vmem:[%s380_s18] sm:$0xff] }
  0x21   : > { %v308_v3 = vpop.eup %307 }
  0x22   : > { %v310_v4 = vpop.eup %309  ;;  %v165_v5 = vmul.f32 0.6931472, %v308_v3 }
  0x23   : > { %v167_v6 = vmul.f32 0.6931472, %v310_v4 }
  0x24   : > { %v168_v7 = vsub.f32 0.0, %v165_v5 }
  0x25   : > { %v169_v8 = vsub.f32 0.0, %v167_v6 }
  0x26   : > { %v170_v9 = vmin.f32 %v168_v7, 100.0 }
  0x27   : > { %v171_v10 = vmin.f32 %v169_v8, 100.0 }
  0x29   : > { %v173_v12 = vadd.f32 %v171_v10, %v170_v9 }
  0x2b   : > { %v174_v13 = vadd.f32 %v173_v12, %v172_v11 }
  0x2d   : > { %175 = vst [vmem:[%s380_s18] sm:$0xff] %v174_v13 }
  0x2e PF: > { %p279_p8 = scmp.le.s32.totalorder %s159_s14, 2048 }
  0x2f   : > { %v180_v14 = vlaneseq (!%p279_p8)  ;;  %v187_v16 = vstv (!%p279_p8), %s277_s10 }
  0x30   : > { %179 = sbr.rel (%p279_p8) target bundleno = 83 (0x53), region = 36 }
  0x31   : > { %v181_v15 = vshrl.u32 (!%p279_p8), %v180_v14, 7  ;;  %v184_v18 = vand.u32 (!%p279_p8), 127, %v180_v14 }
  0x33   : > { %v182_v17 = vadd.s32 (!%p279_p8), 8, %v181_v15  ;;  %v185_v19 = vmul.u32 (!%p279_p8), 128, %v181_v15 }
  0x34   : > { %v204_v35 = vld [vmem:[%s380_s18] sm:$0xff] (!%p279_p8) }
  0x35   : > { %v186_v20 = vmul.u32 (!%p279_p8), 128, %v182_v17  ;;  %v188_v21 = vadd.s32 (!%p279_p8), %v187_v16, %v185_v19 }
  0x37   : > { %v189_v22 = vadd.s32 %v187_v16, %v186_v20  ;;  %v190_v23 = vadd.s32 %v188_v21, %v184_v18 }
  0x39   : > { %v191_v24 = vadd.s32 %v189_v22, %v184_v18  ;;  %vm192_vm0 = vcmp.lt.s32.totalorder %v190_v23, 2048 }
  0x3a   : > { %v194_v25 = vsel %vm192_vm0, %v155_v1, 1.0 }
  0x3b   : > { %vm193_vm1 = vcmp.lt.s32.totalorder %v191_v24, 2048  ;;  %311 = vlog2.f32 %v194_v25 }
  0x3c   : > { %v195_v26 = vsel %vm193_vm1, %v156_v2, 1.0 }
  0x3d   : > { %313 = vlog2.f32 %v195_v26 }
  0x45   : > { %v312_v27 = vpop.eup %311 }
  0x46   : > { %v197_v28 = vmul.f32 0.6931472, %v312_v27 }
  0x47   : > { %v314_v29 = vpop.eup %313 }
  0x48   : > { %v199_v30 = vmul.f32 0.6931472, %v314_v29  ;;  %v200_v31 = vsub.f32 0.0, %v197_v28 }
  0x4a   : > { %v201_v32 = vsub.f32 0.0, %v199_v30  ;;  %v202_v33 = vmin.f32 %v200_v31, 100.0 }
  0x4c   : > { %v203_v34 = vmin.f32 %v201_v32, 100.0 }
  0x4e   : > { %v205_v36 = vadd.f32 %v203_v34, %v202_v33 }
  0x50   : > { %v206_v37 = vadd.f32 %v205_v36, %v204_v35 }
  0x52   : > { %207 = vst [vmem:[%s380_s18] sm:$0xff] %v206_v37 }
  0x53 PF: > { %s11_s8 = sadd.s32 1, %s337_s8   ;;  %s403_s6 = smov %s333_s7 }
  0x54   : > { %p8_p9 = scmp.ge.s32.totalorder %s11_s8, 4   ;;  %s404_s7 = smov %s406_s9 }
  0x56   :  { %10 = sbr.rel (!%p8_p9) target bundleno = 2 (0x2), region = 66 }

</bundles_post_ra>
